<compile_context>
chip_gen: v6e
topology: v6e:2x2x1
jax: 0.10.0
libtpu: 0.0.40
codegen_flags: <defaults>
</compile_context>

<pallas_src>
import functools
import math

import jax
import jax.numpy as jnp
from jax import lax
from jax.experimental import pallas as pl
from jax.experimental.pallas import tpu as pltpu


# ---------------------------------------------------------------------------
# Host-side parameter fusion (peephole fold + bias pre-sum + gate reorder)
# ---------------------------------------------------------------------------
def _reorder_gates(w):
    """Reorder gate columns from PyTorch's [i, f, g, o] to [i, f, o, g]."""
    i, f, g, o = jnp.split(w, 4, axis=-1)
    return jnp.concatenate([i, f, o, g], axis=-1)


def _fuse_params(params, hidden_size, is_peephole):
    """Fuse W_qh/W_ah/W_ih into one input-projection matrix, pre-sum biases.

    The PyTorch reference zeroes columns 2H:3H of q_temp / a_temp AFTER the
    bias add; that equals zeroing those weight columns AND the matching bias
    entries of the qh / ah contributions.
    """
    wqh, wah, wih, whh, bqh, bah, bih, bhh = params
    H = hidden_size
    if is_peephole:
        wqh = wqh.at[:, 2 * H:3 * H].set(0.0)
        wah = wah.at[:, 2 * H:3 * H].set(0.0)
        bqh = bqh.at[2 * H:3 * H].set(0.0)
        bah = bah.at[2 * H:3 * H].set(0.0)
    w_qax = _reorder_gates(jnp.concatenate([wqh, wah, wih], axis=0))  # (Kq,4H)
    w_hh = _reorder_gates(whh)                                        # (H, 4H)
    b = _reorder_gates(bqh + bah + bih + bhh).reshape(1, 4 * H)       # (1, 4H)
    return w_qax, w_hh, b


def _divisor_chunk(total, desired):
    c = max(1, min(desired, total))
    while total % c:
        c -= 1
    return c


# ---------------------------------------------------------------------------
# Pallas recurrence kernel: chunked time axis, in-kernel unrolled loop
# ---------------------------------------------------------------------------
def _recurrence_kernel(gates_ref, h0_ref, c0_ref, whh_ref,
                       h_seq_ref, h_out_ref, c_out_ref,
                       h_scr, c_scr, *, hidden_size, t_chunk):
    H = hidden_size
    ti = pl.program_id(1)  # time-chunk index (arbitrary / serial axis)

    @pl.when(ti == 0)
    def _():
        h_scr[...] = h0_ref[...].astype(jnp.float32)
        c_scr[...] = c0_ref[...].astype(jnp.float32)

    w_hh = whh_ref[...]  # resident across the whole grid

    def step(s, carry):
        h, c = carry
        # gates_ref already holds x/q/a projection + fused bias (precomputed).
        g = gates_ref[s] + jnp.dot(h.astype(w_hh.dtype), w_hh,
                                   preferred_element_type=jnp.float32)
        # Gate order is [i, f, o | g]: sigmoid on 0:3H only, tanh on 3H:4H.
        sig = jax.nn.sigmoid(g[:, 0:3 * H])
        i_g = sig[:, 0:H]
        f_g = sig[:, H:2 * H]
        o_g = sig[:, 2 * H:3 * H]
        g_g = jnp.tanh(g[:, 3 * H:4 * H])
        c_new = f_g * c + i_g * g_g
        h_new = o_g * jnp.tanh(c_new)
        h_seq_ref[s] = h_new.astype(h_seq_ref.dtype)
        return h_new, c_new

    h_fin, c_fin = lax.fori_loop(0, t_chunk, step,
                                 (h_scr[...], c_scr[...]), unroll=True)

    h_scr[...] = h_fin
    c_scr[...] = c_fin
    # Constant index_map along the time axis -> these blocks stay resident in
    # VMEM; writing them every chunk is a cheap VMEM store and avoids relying
    # on "only write at the last step" for the final writeback.
    h_out_ref[...] = h_fin.astype(h_out_ref.dtype)
    c_out_ref[...] = c_fin.astype(c_out_ref.dtype)


# ---------------------------------------------------------------------------
# Sequence wrapper: hoisted input GEMM + Pallas recurrence
# ---------------------------------------------------------------------------
def sqa_lstm_sequence(question_seq, answer_seq, x_seq, h0, c0, params, *,
                      hidden_size, is_peephole=False, t_chunk=8,
                      batch_tile=None, recurrent_dtype=jnp.float32):
    """Run the SQA-LSTM cell over T steps.

    Returns (h_seq (T,B,H), h_final (B,H), c_final (B,H)).
    For v7x pass batch_tile=B//2 so the "parallel" batch axis uses both TCs.
    """
    T, B, _ = question_seq.shape
    H = hidden_size

    w_qax, w_hh, b = _fuse_params(params, H, is_peephole)

    # --- Hoisted input projection: ONE MXU-friendly GEMM over all T*B rows,
    # bias folded in; only the (B,H)@(H,4H) dot remains inside the time loop.
    qax = jnp.concatenate([question_seq, answer_seq, x_seq], axis=2)  # (T,B,Kq)
    gates_in = (jnp.einsum('tbk,kg->tbg', qax, w_qax,
                           preferred_element_type=jnp.float32)
                + b).astype(jnp.float32)                              # (T,B,4H)

    w_hh = w_hh.astype(recurrent_dtype)
    h0 = h0.astype(jnp.float32)
    c0 = c0.astype(jnp.float32)

    tc = _divisor_chunk(T, t_chunk)
    bt = B if batch_tile is None else _divisor_chunk(B, batch_tile)
    nb, nt = B // bt, T // tc
    out_dtype = question_seq.dtype  # halves HBM writeback if inputs are bf16

    kernel = functools.partial(_recurrence_kernel, hidden_size=H, t_chunk=tc)
    grid_spec = pltpu.PrefetchScalarGridSpec(
        num_scalar_prefetch=0,
        grid=(nb, nt),
        in_specs=[
            pl.BlockSpec((tc, bt, 4 * H), lambda bi, ti: (ti, bi, 0)),  # gates
            pl.BlockSpec((bt, H), lambda bi, ti: (bi, 0)),              # h0
            pl.BlockSpec((bt, H), lambda bi, ti: (bi, 0)),              # c0
            pl.BlockSpec((H, 4 * H), lambda bi, ti: (0, 0)),            # w_hh
        ],
        out_specs=(
            pl.BlockSpec((tc, bt, H), lambda bi, ti: (ti, bi, 0)),      # h_seq
            pl.BlockSpec((bt, H), lambda bi, ti: (bi, 0)),              # h_T
            pl.BlockSpec((bt, H), lambda bi, ti: (bi, 0)),              # c_T
        ),
        scratch_shapes=[pltpu.VMEM((bt, H), jnp.float32),               # h carry
                        pltpu.VMEM((bt, H), jnp.float32)],              # c carry
    )
    h_seq, h_T, c_T = pl.pallas_call(
        kernel,
        out_shape=(jax.ShapeDtypeStruct((T, B, H), out_dtype),
                   jax.ShapeDtypeStruct((B, H), jnp.float32),
                   jax.ShapeDtypeStruct((B, H), jnp.float32)),
        grid_spec=grid_spec,
        compiler_params=pltpu.CompilerParams(
            dimension_semantics=("parallel", "arbitrary")),
    )(gates_in, h0, c0, w_hh)
    return h_seq, h_T, c_T


def sqa_lstm_cell(question, answer, x, h_prev, c_prev, params, *,
                  hidden_size, is_peephole=False):
    """SQALSTMCell.forward: single step, routed through the sequence kernel
    with T=1 (per review: no standalone single-step pallas_call)."""
    _, h, c = sqa_lstm_sequence(question[None], answer[None], x[None],
                                h_prev, c_prev, params,
                                hidden_size=hidden_size,
                                is_peephole=is_peephole, t_chunk=1)
    return h, c


# ---------------------------------------------------------------------------
# Init + pure-JAX references
# ---------------------------------------------------------------------------
def init_params(key, question_size, answer_size, input_size, hidden_size):
    stdv = 1.0 / math.sqrt(hidden_size)
    shapes = [
        (question_size, hidden_size * 4),
        (answer_size, hidden_size * 4),
        (input_size, hidden_size * 4),
        (hidden_size, hidden_size * 4),
        (hidden_size * 4,),
        (hidden_size * 4,),
        (hidden_size * 4,),
        (hidden_size * 4,),
    ]
    keys = jax.random.split(key, len(shapes))
    return tuple(jax.random.uniform(k, s, jnp.float32, -stdv, stdv)
                 for k, s in zip(keys, shapes))


def _reference_cell(question, answer, x, h_prev, c_prev, params,
                    hidden_size, is_peephole):
    wqh, wah, wih, whh, bqh, bah, bih, bhh = params
    H = hidden_size
    q_temp = question @ wqh + bqh
    a_temp = answer @ wah + bah
    if is_peephole:
        q_temp = q_temp.at[:, 2 * H:3 * H].set(0.0)
        a_temp = a_temp.at[:, 2 * H:3 * H].set(0.0)
    gates = q_temp + a_temp + x @ wih + bih + h_prev @ whh + bhh
    i_g, f_g, g_g, o_g = jnp.split(gates, 4, axis=1)
    c = jax.nn.sigmoid(f_g) * c_prev + jax.nn.sigmoid(i_g) * jnp.tanh(g_g)
    h = jax.nn.sigmoid(o_g) * jnp.tanh(c)
    return h, c


def _reference_sequence(q_seq, a_seq, x_seq, h0, c0, params,
                        hidden_size, is_peephole):
    h, c = h0, c0
    hs = []
    for t in range(q_seq.shape[0]):
        h, c = _reference_cell(q_seq[t], a_seq[t], x_seq[t], h, c,
                               params, hidden_size, is_peephole)
        hs.append(h)
    return jnp.stack(hs, axis=0), h, c


# ---------------------------------------------------------------------------
if __name__ == "__main__":
    TOL = dict(atol=2e-2, rtol=2e-2)

    def make_inputs(key, T, B, Q, A, I, H):
        k_p, k_q, k_a, k_x, k_h, k_c = jax.random.split(key, 6)
        params = init_params(k_p, Q, A, I, H)
        q_seq = jax.random.normal(k_q, (T, B, Q), jnp.float32)
        a_seq = jax.random.normal(k_a, (T, B, A), jnp.float32)
        x_seq = jax.random.normal(k_x, (T, B, I), jnp.float32)
        h0 = jax.random.normal(k_h, (B, H), jnp.float32)
        c0 = jax.random.normal(k_c, (B, H), jnp.float32)
        return params, q_seq, a_seq, x_seq, h0, c0

    # ---- config 1: the small shapes the module implies (H=32) ----
    B, Q, A, I, H, T = 8, 16, 16, 32, 32, 8
    params, q_seq, a_seq, x_seq, h0, c0 = make_inputs(
        jax.random.PRNGKey(0), T, B, Q, A, I, H)

    # single-step cell (module forward), no peephole
    h, c = sqa_lstm_cell(q_seq[0], a_seq[0], x_seq[0], h0, c0, params,
                         hidden_size=H, is_peephole=False)
    jax.block_until_ready((h, c))
    h_ref, c_ref = _reference_cell(q_seq[0], a_seq[0], x_seq[0], h0, c0,
                                   params, H, False)
    assert jnp.allclose(h, h_ref, **TOL), "cell h mismatch"
    assert jnp.allclose(c, c_ref, **TOL), "cell c mismatch"

    # single-step cell, peephole (folded on host -> same compiled kernel)
    h_p, c_p = sqa_lstm_cell(q_seq[0], a_seq[0], x_seq[0], h0, c0, params,
                             hidden_size=H, is_peephole=True)
    jax.block_until_ready((h_p, c_p))
    h_pr, c_pr = _reference_cell(q_seq[0], a_seq[0], x_seq[0], h0, c0,
                                 params, H, True)
    assert jnp.allclose(h_p, h_pr, **TOL), "peephole h mismatch"
    assert jnp.allclose(c_p, c_pr, **TOL), "peephole c mismatch"

    # sequence: chunked grid (t_chunk=4 -> 2 time chunks), in-kernel loop
    h_seq, h_T, c_T = sqa_lstm_sequence(q_seq, a_seq, x_seq, h0, c0, params,
                                        hidden_size=H, is_peephole=False,
                                        t_chunk=4)
    jax.block_until_ready((h_seq, h_T, c_T))
    h_seq_ref, h_T_ref, c_T_ref = _reference_sequence(
        q_seq, a_seq, x_seq, h0, c0, params, H, False)
    assert jnp.allclose(h_seq, h_seq_ref, **TOL), "seq h mismatch"
    assert jnp.allclose(h_T, h_T_ref, **TOL), "seq h_T mismatch"
    assert jnp.allclose(c_T, c_T_ref, **TOL), "seq c_T mismatch"

    # ---- config 2: lane-aligned hidden size (H=128) per perf review ----
    H2 = 128
    params2, q2, a2, x2, h02, c02 = make_inputs(
        jax.random.PRNGKey(1), T, B, Q, A, I, H2)
    h_seq2, h_T2, c_T2 = sqa_lstm_sequence(q2, a2, x2, h02, c02, params2,
                                           hidden_size=H2, is_peephole=False,
                                           t_chunk=8)
    jax.block_until_ready((h_seq2, h_T2, c_T2))
    h_seq2_ref, h_T2_ref, c_T2_ref = _reference_sequence(
        q2, a2, x2, h02, c02, params2, H2, False)
    assert jnp.allclose(h_seq2, h_seq2_ref, **TOL), "seq(H=128) h mismatch"
    assert jnp.allclose(h_T2, h_T2_ref, **TOL), "seq(H=128) h_T mismatch"
    assert jnp.allclose(c_T2, c_T2_ref, **TOL), "seq(H=128) c_T mismatch"

    print("KERNEL_OK")
</pallas_src>

<mosaic_0001>
module attributes {stable_mosaic.version = 11 : i64} {
  func.func @_recurrence_kernel(%arg0: i32, %arg1: i32, %arg2: memref<1x8x128xf32, #tpu.memory_space<vmem>>, %arg3: memref<8x32xf32, #tpu.memory_space<vmem>>, %arg4: memref<8x32xf32, #tpu.memory_space<vmem>>, %arg5: memref<32x128xf32, #tpu.memory_space<vmem>>, %arg6: memref<1x8x32xf32, #tpu.memory_space<vmem>>, %arg7: memref<8x32xf32, #tpu.memory_space<vmem>>, %arg8: memref<8x32xf32, #tpu.memory_space<vmem>>, %arg9: memref<8x32xf32, #tpu.memory_space<vmem>>, %arg10: memref<8x32xf32, #tpu.memory_space<vmem>>) attributes {dimension_semantics = [#tpu.dimension_semantics<parallel>, #tpu.dimension_semantics<arbitrary>], iteration_bounds = array<i64: 1, 1>, scalar_prefetch = 0 : i64, scratch_operands = 2 : i64, tpu.core_type = #tpu.core_type<tc>, window_params = [{transform_indices = @transform_0, window_bounds = array<i64: 1, 8, 128>}, {transform_indices = @transform_1, window_bounds = array<i64: 8, 32>}, {transform_indices = @transform_2, window_bounds = array<i64: 8, 32>}, {pipeline_mode = #tpu.pipeline_mode<synchronous>, transform_indices = @transform_3, window_bounds = array<i64: 32, 128>}, {transform_indices = @transform_4, window_bounds = array<i64: 1, 8, 32>}, {transform_indices = @transform_5, window_bounds = array<i64: 8, 32>}, {transform_indices = @transform_6, window_bounds = array<i64: 8, 32>}]} {
    %c0_i32 = arith.constant 0 : i32
    %0 = arith.cmpi eq, %arg1, %c0_i32 : i32
    %1 = arith.extui %0 : i1 to i32
    %c0_i32_0 = arith.constant 0 : i32
    %2 = arith.cmpi ne, %1, %c0_i32_0 : i32
    scf.if %2 {
      %c0_20 = arith.constant 0 : index
      %c0_21 = arith.constant 0 : index
      %35 = vector.load %arg3[%c0_20, %c0_21] : memref<8x32xf32, #tpu.memory_space<vmem>>, vector<8x32xf32>
      %c0_22 = arith.constant 0 : index
      %c0_23 = arith.constant 0 : index
      %36 = vector.load %arg9[%c0_22, %c0_23] : memref<8x32xf32, #tpu.memory_space<vmem>>, vector<8x32xf32>
      tpu.vector_store %arg9[%c0_22, %c0_23], %35 {strides = array<i32>} : memref<8x32xf32, #tpu.memory_space<vmem>>, vector<8x32xf32>,
      %c0_24 = arith.constant 0 : index
      %c0_25 = arith.constant 0 : index
      %37 = vector.load %arg4[%c0_24, %c0_25] : memref<8x32xf32, #tpu.memory_space<vmem>>, vector<8x32xf32>
      %c0_26 = arith.constant 0 : index
      %c0_27 = arith.constant 0 : index
      %38 = vector.load %arg10[%c0_26, %c0_27] : memref<8x32xf32, #tpu.memory_space<vmem>>, vector<8x32xf32>
      tpu.vector_store %arg10[%c0_26, %c0_27], %37 {strides = array<i32>} : memref<8x32xf32, #tpu.memory_space<vmem>>, vector<8x32xf32>,
    } else {
    }
    %c0 = arith.constant 0 : index
    %c0_1 = arith.constant 0 : index
    %3 = vector.load %arg5[%c0, %c0_1] : memref<32x128xf32, #tpu.memory_space<vmem>>, vector<32x128xf32>
    %c0_2 = arith.constant 0 : index
    %c0_3 = arith.constant 0 : index
    %4 = vector.load %arg9[%c0_2, %c0_3] : memref<8x32xf32, #tpu.memory_space<vmem>>, vector<8x32xf32>
    %c0_4 = arith.constant 0 : index
    %c0_5 = arith.constant 0 : index
    %5 = vector.load %arg10[%c0_4, %c0_5] : memref<8x32xf32, #tpu.memory_space<vmem>>, vector<8x32xf32>
    %c0_i32_6 = arith.constant 0 : i32
    %6 = arith.index_cast %c0_i32_6 : i32 to index
    %c0_7 = arith.constant 0 : index
    %c0_8 = arith.constant 0 : index
    %7 = vector.load %arg2[%6, %c0_7, %c0_8] : memref<1x8x128xf32, #tpu.memory_space<vmem>>, vector<1x8x128xf32>
    %8 = vector.shape_cast %7 : vector<1x8x128xf32> to vector<8x128xf32>
    %cst = arith.constant dense<0.000000e+00> : vector<8x128xf32>
    %9 = tpu.matmul %4, %3, %cst {dimension_numbers = #tpu.dot_dimension_numbers<[1], [0], [0], [1], [0, 0, 1, 1], [], []>} : vector<8x32xf32>, vector<32x128xf32>, vector<8x128xf32> -> vector<8x128xf32>
    %10 = arith.addf %8, %9 : vector<8x128xf32>
    %11 = vector.extract_strided_slice %10 {offsets = [0, 0], sizes = [8, 96], strides = [1, 1]} : vector<8x128xf32> to vector<8x96xf32>
    %12 = arith.negf %11 : vector<8x96xf32>
    %13 = math.exp %12 : vector<8x96xf32>
    %cst_9 = arith.constant 1.000000e+00 : f32
    %14 = vector.broadcast %cst_9 : f32 to vector<8x96xf32>
    %15 = arith.addf %14, %13 : vector<8x96xf32>
    %16 = arith.divf %14, %15 : vector<8x96xf32>
    %17 = vector.extract_strided_slice %16 {offsets = [0, 0], sizes = [8, 32], strides = [1, 1]} : vector<8x96xf32> to vector<8x32xf32>
    %18 = vector.extract_strided_slice %16 {offsets = [0, 32], sizes = [8, 32], strides = [1, 1]} : vector<8x96xf32> to vector<8x32xf32>
    %19 = vector.extract_strided_slice %16 {offsets = [0, 64], sizes = [8, 32], strides = [1, 1]} : vector<8x96xf32> to vector<8x32xf32>
    %20 = vector.extract_strided_slice %10 {offsets = [0, 96], sizes = [8, 32], strides = [1, 1]} : vector<8x128xf32> to vector<8x32xf32>
    %21 = math.tanh %20 : vector<8x32xf32>
    %22 = arith.mulf %18, %5 : vector<8x32xf32>
    %23 = arith.mulf %17, %21 : vector<8x32xf32>
    %24 = arith.addf %22, %23 : vector<8x32xf32>
    %25 = math.tanh %24 : vector<8x32xf32>
    %26 = arith.mulf %19, %25 : vector<8x32xf32>
    %27 = arith.index_cast %c0_i32_6 : i32 to index
    %c0_10 = arith.constant 0 : index
    %c0_11 = arith.constant 0 : index
    %28 = vector.load %arg6[%27, %c0_10, %c0_11] : memref<1x8x32xf32, #tpu.memory_space<vmem>>, vector<1x8x32xf32>
    %29 = vector.shape_cast %28 : vector<1x8x32xf32> to vector<8x32xf32>
    %30 = vector.shape_cast %26 : vector<8x32xf32> to vector<1x8x32xf32>
    tpu.vector_store %arg6[%27, %c0_10, %c0_11], %30 {strides = array<i32>} : memref<1x8x32xf32, #tpu.memory_space<vmem>>, vector<1x8x32xf32>,
    %c1_i32 = arith.constant 1 : i32
    %c0_12 = arith.constant 0 : index
    %c0_13 = arith.constant 0 : index
    %31 = vector.load %arg9[%c0_12, %c0_13] : memref<8x32xf32, #tpu.memory_space<vmem>>, vector<8x32xf32>
    tpu.vector_store %arg9[%c0_12, %c0_13], %26 {strides = array<i32>} : memref<8x32xf32, #tpu.memory_space<vmem>>, vector<8x32xf32>,
    %c0_14 = arith.constant 0 : index
    %c0_15 = arith.constant 0 : index
    %32 = vector.load %arg10[%c0_14, %c0_15] : memref<8x32xf32, #tpu.memory_space<vmem>>, vector<8x32xf32>
    tpu.vector_store %arg10[%c0_14, %c0_15], %24 {strides = array<i32>} : memref<8x32xf32, #tpu.memory_space<vmem>>, vector<8x32xf32>,
    %c0_16 = arith.constant 0 : index
    %c0_17 = arith.constant 0 : index
    %33 = vector.load %arg7[%c0_16, %c0_17] : memref<8x32xf32, #tpu.memory_space<vmem>>, vector<8x32xf32>
    tpu.vector_store %arg7[%c0_16, %c0_17], %26 {strides = array<i32>} : memref<8x32xf32, #tpu.memory_space<vmem>>, vector<8x32xf32>,
    %c0_18 = arith.constant 0 : index
    %c0_19 = arith.constant 0 : index
    %34 = vector.load %arg8[%c0_18, %c0_19] : memref<8x32xf32, #tpu.memory_space<vmem>>, vector<8x32xf32>
    tpu.vector_store %arg8[%c0_18, %c0_19], %24 {strides = array<i32>} : memref<8x32xf32, #tpu.memory_space<vmem>>, vector<8x32xf32>,
    return
  }
  func.func @transform_0(%arg0: i32, %arg1: i32) -> (i32, i32, i32) {
    %c0_i32 = arith.constant 0 : i32
    %c0_i32_0 = arith.constant 0 : i32
    return %arg1, %arg0, %c0_i32 : i32, i32, i32
  }
  func.func @transform_1(%arg0: i32, %arg1: i32) -> (i32, i32) {
    %c0_i32 = arith.constant 0 : i32
    %c0_i32_0 = arith.constant 0 : i32
    return %arg0, %c0_i32 : i32, i32
  }
  func.func @transform_2(%arg0: i32, %arg1: i32) -> (i32, i32) {
    %c0_i32 = arith.constant 0 : i32
    %c0_i32_0 = arith.constant 0 : i32
    return %arg0, %c0_i32 : i32, i32
  }
  func.func @transform_3(%arg0: i32, %arg1: i32) -> (i32, i32) {
    %c0_i32 = arith.constant 0 : i32
    %c0_i32_0 = arith.constant 0 : i32
    %c0_i32_1 = arith.constant 0 : i32
    return %c0_i32, %c0_i32_0 : i32, i32
  }
  func.func @transform_4(%arg0: i32, %arg1: i32) -> (i32, i32, i32) {
    %c0_i32 = arith.constant 0 : i32
    %c0_i32_0 = arith.constant 0 : i32
    return %arg1, %arg0, %c0_i32 : i32, i32, i32
  }
  func.func @transform_5(%arg0: i32, %arg1: i32) -> (i32, i32) {
    %c0_i32 = arith.constant 0 : i32
    %c0_i32_0 = arith.constant 0 : i32
    return %arg0, %c0_i32 : i32, i32
  }
  func.func @transform_6(%arg0: i32, %arg1: i32) -> (i32, i32) {
    %c0_i32 = arith.constant 0 : i32
    %c0_i32_0 = arith.constant 0 : i32
    return %arg0, %c0_i32 : i32, i32
  }
}

</mosaic_0001>

<bundles_post_ra>
// kernel: tpu_custom_call.1
= control target key start
LH: loop header
LB: loop body
LE: loop exit
PB: predicated region body
PF: predicated region fallthrough
CT: control target
= control target key end

     0   :  { %12 = vsyncpa [#allocation5], 0  ;;  %s515_s0 = inlined_call_operand.hbm [shape: f32[1,8,128], index: 0, kind: input, shape index: {}]   ;;  %s516_s1 = inlined_call_operand.hbm [shape: f32[8,32], index: 1, kind: input, shape index: {}]   ;;  %s517_s2 = inlined_call_operand.hbm [shape: f32[8,32], index: 2, kind: input, shape index: {}]   ;;  %s518_s3 = inlined_call_operand.hbm [shape: f32[32,128], index: 3, kind: input, shape index: {}]   ;;  %s519_s4 = inlined_call_operand.hbm [shape: f32[1,8,32], index: 4, kind: output, shape index: {0}]   ;;  %s520_s5 = inlined_call_operand.hbm [shape: f32[8,32], index: 5, kind: output, shape index: {1}]   ;;  %s521_s6 = inlined_call_operand.hbm [shape: f32[8,32], index: 6, kind: output, shape index: {2}]  }
   0x1   :  { %13 = vsyncpa [#allocation8], 0 }
   0x2   :  { %14 = vsyncpa [#allocation11], 0 }
   0x3   :  { %15 = vsyncpa [#allocation6], 0 }
   0x4   :  { %16 = vsyncpa [#allocation14], 0  ;;  %s437_s21 = smov [#allocation7]   ;;  %s438_s23 = smov [#allocation4]  }
   0x5   :  { %s33_s22 = sshll.u32 %s437_s21, 4  ;;  %s23_s24 = sshll.u32 %s438_s23, 4  ;;  %s34_s22 = int_to_ptr.vmem [resolvable:$true] %s33_s22  ;;  %s24_s24 = int_to_ptr.vmem [resolvable:$true] %s23_s24 }
   0x6   :  { %s295_s25 = scalar_lea.vmem %s34_s22, 128  ;;  %p300_p1 = scmp.lt.s32.totalorder %s34_s22, %s34_s22 }
   0x7   :  { %p296_p0 = scmp.ne.s32.totalorder %s34_s22, %s295_s25  ;;  %p301_p2 = scmp.lt.s32.totalorder %s295_s25, %s295_s25 }
   0x9   :  { %p302_p3 = por %p301_p2, %p300_p1 }
   0xb   :  { %p303_p4 = pnand %p302_p3, %p296_p0 }
   0xd   :  { %306 = shalt.err (!%p303_p4)
}
   0xe   :  { %36 = dma.hbm_to_vmem [thread:$0]  %s516_s1, 128, %s34_s22, [#allocation8]  }
   0xf   :  { %s315_s28 = scalar_lea.vmem %s24_s24, 128  ;;  %p320_p6 = scmp.lt.s32.totalorder %s24_s24, %s24_s24 }
  0x10   :  { %p316_p5 = scmp.ne.s32.totalorder %s24_s24, %s315_s28  ;;  %p321_p7 = scmp.lt.s32.totalorder %s315_s28, %s315_s28 }
  0x12   :  { %p322_p8 = por %p321_p7, %p320_p6 }
  0x14   :  { %p323_p9 = pnand %p322_p8, %p316_p5 }
  0x16   :  { %326 = shalt.err (!%p323_p9)
}
  0x17   :  { %26 = dma.hbm_to_vmem [thread:$0]  %s515_s0, 128, %s24_s24, [#allocation5]  }
  0x18   :  { %s439_s7 = smov [#allocation9]   ;;  %s440_s9 = smov [#allocation10]  }
  0x19   :  { %s43_s8 = sshll.u32 %s439_s7, 4  ;;  %s52_s10 = sshll.u32 %s440_s9, 4  ;;  %s44_s8 = int_to_ptr.vmem [resolvable:$true] %s43_s8  ;;  %s53_s10 = int_to_ptr.vmem [resolvable:$true] %s52_s10 }
  0x1a   :  { %s335_s11 = scalar_lea.vmem %s44_s8, 128  ;;  %p340_p11 = scmp.lt.s32.totalorder %s44_s8, %s44_s8 }
  0x1b   :  { %p336_p10 = scmp.ne.s32.totalorder %s44_s8, %s335_s11  ;;  %p341_p12 = scmp.lt.s32.totalorder %s335_s11, %s335_s11 }
  0x1d   :  { %p342_p13 = por %p341_p12, %p340_p11 }
  0x1f   :  { %p343_p0 = pnand %p342_p13, %p336_p10 }
  0x21   :  { %346 = shalt.err (!%p343_p0)
}
  0x22   :  { %46 = dma.hbm_to_vmem [thread:$0]  %s517_s2, 128, %s44_s8, [#allocation8]  }
  0x23   :  { %s355_s13 = scalar_lea.vmem %s53_s10, 512  ;;  %p360_p2 = scmp.lt.s32.totalorder %s53_s10, %s53_s10 }
  0x24   :  { %p356_p1 = scmp.ne.s32.totalorder %s53_s10, %s355_s13  ;;  %p361_p3 = scmp.lt.s32.totalorder %s355_s13, %s355_s13 }
  0x26   :  { %p362_p4 = por %p361_p3, %p360_p2 }
  0x28   :  { %p363_p5 = pnand %p362_p4, %p356_p1 }
  0x2a   :  { %366 = shalt.err (!%p363_p5)
}
  0x2b   :  { %s441_s0 = smov 128   ;;  %s442_s14 = smov 8  }
  0x2c   :  { %58 = dma.hbm_to_vmem [thread:$0]  %s518_s3, 512, %s53_s10, [#allocation11], %s441_s0, %s441_s0, %s442_s14  }
  0x2d   :  { %427 = dma.done.wait [#allocation5], 128  }
  0x2e   :  { %428 = vsyncadd [#allocation5], 4294967168 }
  0x2f   :  { %429 = dma.done.wait [#allocation8], 256  }
  0x30   :  { %430 = vsyncadd [#allocation8], 4294967040 }
  0x31   :  { %431 = dma.done.wait [#allocation11], 512  }
  0x32   :  { %432 = vsyncadd [#allocation11], 4294966784  ;;  %v443_v0 = vmov 0.0   ;;  %vm444_vm0 = vmmov 0   ;;  %vm76_vm1 = vcmask 261120   ;;  %v83_v1 = vld [vmem:[#allocation10 + $0x18] sm:$0xff] }
  0x33   :  { %254 = vmatprep.subr.mxu0 %v443_v0  ;;  %262 = vmatprep.mubr.msk.f32.mxu0 %vm444_vm0, %v443_v0  ;;  %v82_v2 = vld [vmem:[#allocation10 + $0x10] sm:$0xff]  ;;  %v78_v4 = vld [vmem:[#allocation9] sm:$0xff]  ;;  %v81_v5 = vld [vmem:[#allocation10 + $0x8] sm:$0xff]  ;;  %s445_s2 = smov 32   ;;  %s446_s3 = smov 96  }
  0x34   :  { %255 = vmatpush3.msra.mxu0 %v83_v1  ;;  %v75_v3 = vld [vmem:[#allocation7] sm:$0xff]  ;;  %79 = vst.msk [vmem:[#allocation3] sm:$0xff] %vm76_vm1, %v78_v4  ;;  %v80_v6 = vld [vmem:[#allocation10] sm:$0xff]  ;;  %v86_v8 = vld [vmem:[#allocation4] sm:$0xff]  ;;  %s447_s17 = smov 64   ;;  %s448_s18 = smov [#allocation13]  }
  0x35   :  { %256 = vmatprep.subr.mxu0 %v443_v0  ;;  %77 = vst.msk [vmem:[#allocation2] sm:$0xff] %vm76_vm1, %v75_v3  ;;  %s219_s19 = sshll.u32 %s448_s18, 4  ;;  %s449_s20 = smov [#allocation12]   ;;  %s220_s19 = int_to_ptr.vmem [resolvable:$true] %s219_s19 }
  0x36   :  { %257 = vmatpush3.msra.mxu0 %v82_v2  ;;  %s209_s21 = sshll.u32 %s449_s20, 4  ;;  %s450_s22 = smov [#allocation15]   ;;  %s210_s21 = int_to_ptr.vmem [resolvable:$true] %s209_s21 }
  0x37   :  { %258 = vmatprep.subr.mxu0 %v443_v0  ;;  %s229_s23 = sshll.u32 %s450_s22, 4  ;;  %s367_s24 = scalar_lea.vmem %s220_s19, 128  ;;  %s230_s23 = int_to_ptr.vmem [resolvable:$true] %s229_s23 }
  0x38   :  { %259 = vmatpush3.msra.mxu0 %v81_v5  ;;  %p368_p6 = scmp.ne.s32.totalorder %s220_s19, %s367_s24  ;;  %p372_p7 = scmp.lt.s32.totalorder %s220_s19, %s220_s19 }
  0x39   :  { %260 = vmatprep.subr.mxu0 %v443_v0  ;;  %p373_p8 = scmp.lt.s32.totalorder %s367_s24, %s367_s24 }
  0x3a   :  { %261 = vmatpush3.msra.mxu0 %v80_v6 }
  0x3b   :  { %v85_v13 = vld [vmem:[#allocation3] sm:$0xff]  ;;  %p374_p9 = por %p373_p8, %p372_p7 }
  0x3c   :  { %v84_v7 = vld [vmem:[#allocation2] sm:$0xff] }
  0x3d   :  { %263 = vmatmul.mubr.msk.f32.vlgmr.msra.gmra.mxu0 %vm76_vm1, %v84_v7  ;;  %p375_p10 = pnand %p374_p9, %p368_p6 }
  0xfd   :  { %v157_v9 = vpop.f32.mrf.mxu0 }
  0xfe   :  { %v161_v10 = vadd.f32 %v157_v9, %v86_v8 }
  0xff   :  { %v264_v11 = vpop.f32.mrf.mxu0 }
 0x100   :  { %279 = vtanh.f32 %v161_v10  ;;  %v248_v14 = vmul.f32 -1.442695, %v161_v10 }
 0x102   :  { %281 = vpow2.f32 %v248_v14 }
 0x10d   :  { %v280_v12 = vpop.eup %279 }
 0x10e   :  { %175 = vrot.lane.b32.xlu0 %v280_v12, %s445_s2 }
 0x10f   :  { %v282_v15 = vpop.eup %281 }
 0x110   :  { %v165_v16 = vadd.f32 1.0, %v282_v15 }
 0x112   :  { %170 = vrot.lane.b32.xlu0 %v85_v13, %s445_s2  ;;  %283 = vrcp.f32 %v165_v16 }
 0x11f   :  { %v284_v17 = vpop.eup %283 }
 0x180   :  { %v176_v18 = vpop.permute.xlu0 %175 }
 0x181   :  { %v178_v19 = vmul.f32 %v284_v17, %v176_v18 }
 0x183   :  { %180 = vrot.lane.b32.xlu1 %v178_v19, %s445_s2 }
 0x184   :  { %v171_v20 = vpop.permute.xlu0 %170 }
 0x185   :  { %v173_v21 = vmul.f32 %v284_v17, %v171_v20 }
 0x1f5   :  { %v181_v22 = vpop.permute.xlu1 %180 }
 0x1f6   :  { %v183_v23 = vadd.f32 %v181_v22, %v173_v21 }
 0x1f8   :  { %285 = vtanh.f32 %v183_v23 }
 0x205   :  { %v286_v24 = vpop.eup %285 }
 0x206   :  { %186 = vrot.lane.b32.xlu1 %v286_v24, %s445_s2 }
 0x20a   :  { %197 = vrot.lane.b32.xlu1 %v183_v23, %s446_s3 }
 0x278   :  { %v187_v25 = vpop.permute.xlu1 %186 }
 0x279   :  { %v189_v26 = vmul.f32 %v284_v17, %v187_v25 }
 0x27b   :  { %191 = vrot.lane.b32.xlu0 %v189_v26, %s447_s17 }
 0x27c   :  { %v198_v27 = vpop.permute.xlu1 %197 }
 0x27d   :  { %200 = vst.msk [vmem:[#allocation3] sm:$0xff] %vm76_vm1, %v198_v27  ;;  %202 = vst.msk [vmem:[#allocation15] sm:$0xff] %vm76_vm1, %v198_v27 }
 0x2ed   :  { %v192_v28 = vpop.permute.xlu0 %191 }
 0x2ee   :  { %195 = vst.msk [vmem:[#allocation2] sm:$0xff] %vm76_vm1, %v192_v28  ;;  %194 = vst.msk [vmem:[#allocation12] sm:$0xff] %vm76_vm1, %v192_v28 }
 0x2ef   :  { %201 = vst.msk [vmem:[#allocation13] sm:$0xff] %vm76_vm1, %v192_v28 }
 0x2f0   :  { %378 = shalt.err (!%p375_p10)
}
 0x2f1   :  { %222 = dma.vmem_to_hbm [thread:$0]  %s220_s19, 128, %s520_s5, [#allocation14]  }
 0x2f2   :  { %s387_s27 = scalar_lea.vmem %s210_s21, 128  ;;  %p392_p12 = scmp.lt.s32.totalorder %s210_s21, %s210_s21 }
 0x2f3   :  { %p388_p11 = scmp.ne.s32.totalorder %s210_s21, %s387_s27  ;;  %p393_p13 = scmp.lt.s32.totalorder %s387_s27, %s387_s27 }
 0x2f5   :  { %p394_p0 = por %p393_p13, %p392_p12 }
 0x2f7   :  { %p395_p1 = pnand %p394_p0, %p388_p11 }
 0x2f9   :  { %398 = shalt.err (!%p395_p1)
}
 0x2fa   :  { %212 = dma.vmem_to_hbm [thread:$0]  %s210_s21, 128, %s519_s4, [#allocation6]  }
 0x2fb   :  { %s407_s30 = scalar_lea.vmem %s230_s23, 128  ;;  %p412_p3 = scmp.lt.s32.totalorder %s230_s23, %s230_s23 }
 0x2fc   :  { %p408_p2 = scmp.ne.s32.totalorder %s230_s23, %s407_s30  ;;  %p413_p4 = scmp.lt.s32.totalorder %s407_s30, %s407_s30 }
 0x2fe   :  { %p414_p5 = por %p413_p4, %p412_p3 }
 0x300   :  { %p415_p6 = pnand %p414_p5, %p408_p2 }
 0x302   :  { %418 = shalt.err (!%p415_p6)
}
 0x303   :  { %232 = dma.vmem_to_hbm [thread:$0]  %s230_s23, 128, %s521_s6, [#allocation14]  }
 0x304   :  { %433 = dma.done.wait [#allocation6], 128  }
 0x305   :  { %434 = vsyncadd [#allocation6], 4294967168 }
 0x306   :  { %435 = dma.done.wait [#allocation14], 256  }
 0x307   :  { %436 = vsyncadd [#allocation14], 4294967040 }
 0x308   :  { %242 = vsyncpa [#allocation5], 1 }
 0x309   :  { %243 = vsyncpa [#allocation8], 1 }
 0x30a   :  { %244 = vsyncpa [#allocation11], 1 }
 0x30b   :  { %245 = vsyncpa [#allocation6], 1 }
 0x30c   :  { %246 = vsyncpa [#allocation14], 1 }

</bundles_post_ra>
